<compile_context>
chip_gen: v5e
topology: v5e:2x2
jax: 0.10.0
libtpu: 0.0.40
codegen_flags: <defaults>
</compile_context>

<pallas_src>
import functools

import jax
import jax.numpy as jnp
from jax import lax
from jax.experimental import pallas as pl
from jax.experimental.pallas import tpu as pltpu


def _coordconv_kernel(H, W, Cin, Cpad, Bt, x_ref, c_ref, w_ref, o_ref, slab_ref):
    """x_ref: (Bt, Cin, HW); c_ref: (Cpad-Cin, HWpad); w_ref: (Cout, 9*Cpad);
    o_ref: (Bt, Cout, HW); slab_ref: (Bt, Cpad, HWpad) VMEM scratch."""
    HW = H * W
    HWpad = HW + 2 * (W + 1)
    f32 = jnp.float32

    # ---- assemble the padded, augmented slab entirely in VMEM.  Everything the
    # kernel reads is rewritten this step (no persistent state), so the batch
    # grid axis can be sharded across TensorCores safely. ----
    zhalo = jnp.zeros((Bt, Cpad, W + 1), f32)
    slab_ref[:, :, :W + 1] = zhalo                      # left halo  (conv zero pad)
    slab_ref[:, :, W + 1 + HW:] = zhalo                 # right halo (conv zero pad)
    slab_ref[:, Cin:, :] = jnp.broadcast_to(            # xx, yy, ones(bias), zero chans
        c_ref[...].astype(f32), (Bt, Cpad - Cin, HWpad))
    slab_ref[:, :Cin, W + 1:W + 1 + HW] = x_ref[...].astype(f32)

    slab = slab_ref[...]

    # ---- row-wrap masks: two pre-masked slab copies instead of six full-width
    # selects.  Slab lane p maps to source flat position p-(W+1); p % W == 0 is
    # source column W-1 (invalid read for the dw=-1 taps), p % W == 1 is source
    # column 0 (invalid for the dw=+1 taps). ----
    lane = lax.broadcasted_iota(jnp.int32, (1, 1, HWpad), 2)
    colm = lane % W
    slab_nolast = jnp.where(colm == 0, 0.0, slab)       # feeds kw == 0 taps
    slab_nofirst = jnp.where(colm == 1, 0.0, slab)      # feeds kw == 2 taps
    srcs = (slab_nolast, slab, slab_nofirst)

    # ---- gather the 9 shifted taps (sublane concat, each piece Cpad = multiple
    # of 8 sublanes) for all Bt images (lane concat, HW = multiple of 128) and
    # run one fused MXU matmul with N = Bt*HW.  Bias rides in via the ones
    # channel's center-tap weight column. ----
    cols = []
    for b in range(Bt):
        sl = tuple(s[b] for s in srcs)                  # each (Cpad, HWpad)
        rows = []
        for kh in range(3):
            for kw in range(3):
                off = (W + 1) + (kh - 1) * W + (kw - 1)
                rows.append(sl[kw][:, off:off + HW])    # (Cpad, HW) static slice
        cols.append(jnp.concatenate(rows, axis=0))      # (9*Cpad, HW)
    xcat = cols[0] if Bt == 1 else jnp.concatenate(cols, axis=-1)   # (9*Cpad, Bt*HW)

    res = jnp.dot(w_ref[...].astype(f32), xcat,
                  preferred_element_type=f32)           # (Cout, Bt*HW), bias included
    for b in range(Bt):
        o_ref[b] = res[:, b * HW:(b + 1) * HW].astype(o_ref.dtype)


def _pick_batch_tile(B, Cpad, HW, HWpad, budget_bytes=6 * 1024 * 1024):
    """Largest divisor of B whose per-step VMEM footprint stays well under budget."""
    per_img = 4 * (9 * Cpad * HW + 3 * Cpad * HWpad + 4 * Cpad * HW)
    bt = max(1, min(B, 16, budget_bytes // max(per_img, 1)))
    while B % bt:
        bt -= 1
    return bt


def coord_conv(x, weight, bias):
    """CoordConv forward: AddCoords(with_r=False) + Conv2d(k=3, stride=1, padding=1).

    x: (B, Cin, H, W); weight: (Cout, Cin+2, 3, 3); bias: (Cout,).
    Returns (B, Cout, H, W).
    """
    B, Cin, H, W = x.shape
    Cout = weight.shape[0]
    HW = H * W
    HWpad = HW + 2 * (W + 1)
    # input channels + xx + yy + ones(bias), rounded up to 8 sublanes (f32)
    Cpad = ((Cin + 3 + 7) // 8) * 8
    Cextra = Cpad - Cin
    dt = x.dtype

    # ---- tiny constant operand: coordinate / ones / zero channels with halo ----
    # AddCoords semantics: xx varies along H (x_dim), yy varies along W (y_dim).
    xx = jnp.broadcast_to(((jnp.arange(H, dtype=dt) / (H - 1)) * 2.0 - 1.0)[:, None],
                          (H, W)).reshape(HW)
    yy = jnp.broadcast_to(((jnp.arange(W, dtype=dt) / (W - 1)) * 2.0 - 1.0)[None, :],
                          (H, W)).reshape(HW)
    ones = jnp.ones((HW,), dt)
    consts = jnp.stack([xx, yy, ones] + [jnp.zeros((HW,), dt)] * (Cextra - 3), axis=0)
    consts = jnp.pad(consts, ((0, 0), (W + 1, W + 1)))               # (Cextra, HWpad)

    # ---- weights: OIHW -> (Cout, 9*Cpad), taps in (kh, kw) order, channels padded
    # to Cpad; bias folded into the ones channel's center-tap column ----
    w_t = jnp.transpose(weight, (0, 2, 3, 1))                         # (Cout, 3, 3, Cin+2)
    w_t = jnp.pad(w_t, ((0, 0), (0, 0), (0, 0), (0, Cpad - (Cin + 2))))
    w_t = w_t.at[:, 1, 1, Cin + 2].set(bias.astype(w_t.dtype))
    w_cat = w_t.reshape(Cout, 9 * Cpad)

    x3 = x.reshape(B, Cin, HW)                                        # free reshape

    Bt = _pick_batch_tile(B, Cpad, HW, HWpad)
    kernel = functools.partial(_coordconv_kernel, H, W, Cin, Cpad, Bt)

    out = pl.pallas_call(
        kernel,
        out_shape=jax.ShapeDtypeStruct((B, Cout, HW), dt),
        grid=(B // Bt,),
        in_specs=[
            pl.BlockSpec((Bt, Cin, HW), lambda b: (b, 0, 0)),        # raw pixels per tile
            pl.BlockSpec((Cextra, HWpad), lambda b: (0, 0)),         # constant channels
            pl.BlockSpec((Cout, 9 * Cpad), lambda b: (0, 0)),        # fused weights (+bias)
        ],
        out_specs=pl.BlockSpec((Bt, Cout, HW), lambda b: (b, 0, 0)),
        scratch_shapes=[pltpu.VMEM((Bt, Cpad, HWpad), jnp.float32)],
        compiler_params=pltpu.CompilerParams(
            dimension_semantics=("parallel",)),
    )(x3, consts, w_cat)

    return out.reshape(B, Cout, H, W)


def coord_conv_reference(x, weight, bias):
    """Pure-JAX reference mirroring the PyTorch module semantics."""
    B, Cin, H, W = x.shape
    i = jnp.arange(H, dtype=jnp.float32) / (H - 1) * 2.0 - 1.0
    j = jnp.arange(W, dtype=jnp.float32) / (W - 1) * 2.0 - 1.0
    xx = jnp.broadcast_to(i[None, None, :, None], (B, 1, H, W))       # varies along H
    yy = jnp.broadcast_to(j[None, None, None, :], (B, 1, H, W))       # varies along W
    aug = jnp.concatenate([x, xx, yy], axis=1)
    out = lax.conv_general_dilated(
        aug, weight, window_strides=(1, 1), padding=((1, 1), (1, 1)),
        dimension_numbers=("NCHW", "OIHW", "NCHW"))
    return out + bias[None, :, None, None]


if __name__ == "__main__":
    B, Cin, H, W = 2, 4, 16, 16
    Cout = 8

    key = jax.random.PRNGKey(0)
    kx, kw, kb = jax.random.split(key, 3)
    x = jax.random.normal(kx, (B, Cin, H, W), dtype=jnp.float32)
    # Conv2d(in_channels=Cin+2, out_channels=Cout, kernel_size=3, padding=1) params,
    # initialized deterministically (synthetic, no checkpoint load).
    weight = jax.random.normal(kw, (Cout, Cin + 2, 3, 3), dtype=jnp.float32) * 0.1
    bias = jax.random.normal(kb, (Cout,), dtype=jnp.float32) * 0.1

    out = coord_conv(x, weight, bias)
    out = jax.block_until_ready(out)

    ref = coord_conv_reference(x, weight, bias)
    assert out.shape == (B, Cout, H, W)
    assert jnp.allclose(out, ref, atol=1e-4, rtol=1e-4), float(jnp.max(jnp.abs(out - ref)))

    print("KERNEL_OK")
</pallas_src>

<mosaic_0001>
module attributes {stable_mosaic.version = 11 : i64} {
  func.func @_coordconv_kernel(%arg0: i32, %arg1: memref<2x4x256xf32, #tpu.memory_space<vmem>>, %arg2: memref<4x290xf32, #tpu.memory_space<vmem>>, %arg3: memref<8x72xf32, #tpu.memory_space<vmem>>, %arg4: memref<2x8x256xf32, #tpu.memory_space<vmem>>, %arg5: memref<2x8x290xf32, #tpu.memory_space<vmem>>) attributes {dimension_semantics = [#tpu.dimension_semantics<parallel>], iteration_bounds = array<i64: 1>, scalar_prefetch = 0 : i64, scratch_operands = 1 : i64, tpu.core_type = #tpu.core_type<tc>, window_params = [{transform_indices = @transform_0, window_bounds = array<i64: 2, 4, 256>}, {pipeline_mode = #tpu.pipeline_mode<synchronous>, transform_indices = @transform_1, window_bounds = array<i64: 4, 290>}, {pipeline_mode = #tpu.pipeline_mode<synchronous>, transform_indices = @transform_2, window_bounds = array<i64: 8, 72>}, {transform_indices = @transform_3, window_bounds = array<i64: 2, 8, 256>}]} {
    %cst = arith.constant 0.000000e+00 : f32
    %0 = vector.broadcast %cst : f32 to vector<2x8x17xf32>
    %c0 = arith.constant 0 : index
    %c0_0 = arith.constant 0 : index
    %c0_1 = arith.constant 0 : index
    %1 = vector.load %arg5[%c0, %c0_0, %c0_1] : memref<2x8x290xf32, #tpu.memory_space<vmem>>, vector<2x8x17xf32>
    tpu.vector_store %arg5[%c0, %c0_0, %c0_1], %0 {strides = array<i32>} : memref<2x8x290xf32, #tpu.memory_space<vmem>>, vector<2x8x17xf32>,
    %c0_2 = arith.constant 0 : index
    %c0_3 = arith.constant 0 : index
    %c273 = arith.constant 273 : index
    %2 = vector.load %arg5[%c0_2, %c0_3, %c273] : memref<2x8x290xf32, #tpu.memory_space<vmem>>, vector<2x8x17xf32>
    tpu.vector_store %arg5[%c0_2, %c0_3, %c273], %0 {strides = array<i32>} : memref<2x8x290xf32, #tpu.memory_space<vmem>>, vector<2x8x17xf32>,
    %c0_4 = arith.constant 0 : index
    %c0_5 = arith.constant 0 : index
    %3 = vector.load %arg2[%c0_4, %c0_5] : memref<4x290xf32, #tpu.memory_space<vmem>>, vector<4x290xf32>
    %4 = vector.shape_cast %3 : vector<4x290xf32> to vector<1x4x290xf32>
    %5 = vector.broadcast %4 : vector<1x4x290xf32> to vector<2x4x290xf32>
    %c0_6 = arith.constant 0 : index
    %c4 = arith.constant 4 : index
    %c0_7 = arith.constant 0 : index
    %6 = vector.load %arg5[%c0_6, %c4, %c0_7] : memref<2x8x290xf32, #tpu.memory_space<vmem>>, vector<2x4x290xf32>
    tpu.vector_store %arg5[%c0_6, %c4, %c0_7], %5 {strides = array<i32>} : memref<2x8x290xf32, #tpu.memory_space<vmem>>, vector<2x4x290xf32>,
    %c0_8 = arith.constant 0 : index
    %c0_9 = arith.constant 0 : index
    %c0_10 = arith.constant 0 : index
    %7 = vector.load %arg1[%c0_8, %c0_9, %c0_10] : memref<2x4x256xf32, #tpu.memory_space<vmem>>, vector<2x4x256xf32>
    %c0_11 = arith.constant 0 : index
    %c0_12 = arith.constant 0 : index
    %c17 = arith.constant 17 : index
    %8 = vector.load %arg5[%c0_11, %c0_12, %c17] : memref<2x8x290xf32, #tpu.memory_space<vmem>>, vector<2x4x256xf32>
    tpu.vector_store %arg5[%c0_11, %c0_12, %c17], %7 {strides = array<i32>} : memref<2x8x290xf32, #tpu.memory_space<vmem>>, vector<2x4x256xf32>,
    %c0_13 = arith.constant 0 : index
    %c0_14 = arith.constant 0 : index
    %c0_15 = arith.constant 0 : index
    %9 = vector.load %arg5[%c0_13, %c0_14, %c0_15] : memref<2x8x290xf32, #tpu.memory_space<vmem>>, vector<2x8x290xf32>
    %10 = tpu.iota {dimensions = array<i32: 2>} : vector<1x1x290xi32>
    %c16_i32 = arith.constant 16 : i32
    %c0_i32 = arith.constant 0 : i32
    %11 = arith.cmpi eq, %c16_i32, %c0_i32 : i32
    %c1_i32 = arith.constant 1 : i32
    %12 = arith.select %11, %c1_i32, %c16_i32 : i32
    %13 = vector.broadcast %12 : i32 to vector<1x1x290xi32>
    %14 = arith.remsi %10, %13 : vector<1x1x290xi32>
    %c0_i32_16 = arith.constant 0 : i32
    %15 = vector.broadcast %c0_i32_16 : i32 to vector<1x1x290xi32>
    %16 = arith.cmpi ne, %14, %15 : vector<1x1x290xi32>
    %c0_i32_17 = arith.constant 0 : i32
    %17 = vector.broadcast %c0_i32_17 : i32 to vector<1x1x290xi32>
    %18 = arith.cmpi slt, %14, %17 : vector<1x1x290xi32>
    %c0_i32_18 = arith.constant 0 : i32
    %19 = arith.cmpi slt, %12, %c0_i32_18 : i32
    %20 = vector.broadcast %19 : i1 to vector<1x1x290xi1>
    %21 = vector.broadcast %20 : vector<1x1x290xi1> to vector<1x1x290xi1>
    %22 = arith.xori %18, %21 : vector<1x1x290xi1>
    %23 = arith.andi %22, %16 : vector<1x1x290xi1>
    %24 = vector.broadcast %12 : i32 to vector<1x1x290xi32>
    %25 = arith.addi %14, %24 : vector<1x1x290xi32>
    %26 = arith.select %23, %25, %14 : vector<1x1x290xi1>, vector<1x1x290xi32>
    %c0_i32_19 = arith.constant 0 : i32
    %27 = vector.broadcast %c0_i32_19 : i32 to vector<1x1x290xi32>
    %28 = arith.cmpi eq, %26, %27 : vector<1x1x290xi32>
    %cst_20 = arith.constant 0.000000e+00 : f32
    %29 = vector.shape_cast %28 : vector<1x1x290xi1> to vector<1x1x290xi1>
    %30 = vector.broadcast %29 : vector<1x1x290xi1> to vector<2x8x290xi1>
    %31 = vector.broadcast %cst_20 : f32 to vector<2x8x290xf32>
    %32 = arith.select %30, %31, %9 : vector<2x8x290xi1>, vector<2x8x290xf32>
    %c1_i32_21 = arith.constant 1 : i32
    %33 = vector.broadcast %c1_i32_21 : i32 to vector<1x1x290xi32>
    %34 = arith.cmpi eq, %26, %33 : vector<1x1x290xi32>
    %cst_22 = arith.constant 0.000000e+00 : f32
    %35 = vector.shape_cast %34 : vector<1x1x290xi1> to vector<1x1x290xi1>
    %36 = vector.broadcast %35 : vector<1x1x290xi1> to vector<2x8x290xi1>
    %37 = vector.broadcast %cst_22 : f32 to vector<2x8x290xf32>
    %38 = arith.select %36, %37, %9 : vector<2x8x290xi1>, vector<2x8x290xf32>
    %39 = vector.extract_strided_slice %32 {offsets = [0, 0, 0], sizes = [1, 8, 290], strides = [1, 1, 1]} : vector<2x8x290xf32> to vector<1x8x290xf32>
    %40 = vector.shape_cast %39 : vector<1x8x290xf32> to vector<8x290xf32>
    %41 = vector.extract_strided_slice %9 {offsets = [0, 0, 0], sizes = [1, 8, 290], strides = [1, 1, 1]} : vector<2x8x290xf32> to vector<1x8x290xf32>
    %42 = vector.shape_cast %41 : vector<1x8x290xf32> to vector<8x290xf32>
    %43 = vector.extract_strided_slice %38 {offsets = [0, 0, 0], sizes = [1, 8, 290], strides = [1, 1, 1]} : vector<2x8x290xf32> to vector<1x8x290xf32>
    %44 = vector.shape_cast %43 : vector<1x8x290xf32> to vector<8x290xf32>
    %45 = vector.extract_strided_slice %40 {offsets = [0, 0], sizes = [8, 256], strides = [1, 1]} : vector<8x290xf32> to vector<8x256xf32>
    %46 = vector.extract_strided_slice %42 {offsets = [0, 1], sizes = [8, 256], strides = [1, 1]} : vector<8x290xf32> to vector<8x256xf32>
    %47 = vector.extract_strided_slice %44 {offsets = [0, 2], sizes = [8, 256], strides = [1, 1]} : vector<8x290xf32> to vector<8x256xf32>
    %48 = vector.extract_strided_slice %40 {offsets = [0, 16], sizes = [8, 256], strides = [1, 1]} : vector<8x290xf32> to vector<8x256xf32>
    %49 = vector.extract_strided_slice %42 {offsets = [0, 17], sizes = [8, 256], strides = [1, 1]} : vector<8x290xf32> to vector<8x256xf32>
    %50 = vector.extract_strided_slice %44 {offsets = [0, 18], sizes = [8, 256], strides = [1, 1]} : vector<8x290xf32> to vector<8x256xf32>
    %51 = vector.extract_strided_slice %40 {offsets = [0, 32], sizes = [8, 256], strides = [1, 1]} : vector<8x290xf32> to vector<8x256xf32>
    %52 = vector.extract_strided_slice %42 {offsets = [0, 33], sizes = [8, 256], strides = [1, 1]} : vector<8x290xf32> to vector<8x256xf32>
    %53 = vector.extract_strided_slice %44 {offsets = [0, 34], sizes = [8, 256], strides = [1, 1]} : vector<8x290xf32> to vector<8x256xf32>
    %54 = tpu.concatenate %45, %46, %47, %48, %49, %50, %51, %52, %53 in 0 : vector<8x256xf32>, vector<8x256xf32>, vector<8x256xf32>, vector<8x256xf32>, vector<8x256xf32>, vector<8x256xf32>, vector<8x256xf32>, vector<8x256xf32>, vector<8x256xf32> -> vector<72x256xf32>
    %55 = vector.extract_strided_slice %32 {offsets = [1, 0, 0], sizes = [1, 8, 290], strides = [1, 1, 1]} : vector<2x8x290xf32> to vector<1x8x290xf32>
    %56 = vector.shape_cast %55 : vector<1x8x290xf32> to vector<8x290xf32>
    %57 = vector.extract_strided_slice %9 {offsets = [1, 0, 0], sizes = [1, 8, 290], strides = [1, 1, 1]} : vector<2x8x290xf32> to vector<1x8x290xf32>
    %58 = vector.shape_cast %57 : vector<1x8x290xf32> to vector<8x290xf32>
    %59 = vector.extract_strided_slice %38 {offsets = [1, 0, 0], sizes = [1, 8, 290], strides = [1, 1, 1]} : vector<2x8x290xf32> to vector<1x8x290xf32>
    %60 = vector.shape_cast %59 : vector<1x8x290xf32> to vector<8x290xf32>
    %61 = vector.extract_strided_slice %56 {offsets = [0, 0], sizes = [8, 256], strides = [1, 1]} : vector<8x290xf32> to vector<8x256xf32>
    %62 = vector.extract_strided_slice %58 {offsets = [0, 1], sizes = [8, 256], strides = [1, 1]} : vector<8x290xf32> to vector<8x256xf32>
    %63 = vector.extract_strided_slice %60 {offsets = [0, 2], sizes = [8, 256], strides = [1, 1]} : vector<8x290xf32> to vector<8x256xf32>
    %64 = vector.extract_strided_slice %56 {offsets = [0, 16], sizes = [8, 256], strides = [1, 1]} : vector<8x290xf32> to vector<8x256xf32>
    %65 = vector.extract_strided_slice %58 {offsets = [0, 17], sizes = [8, 256], strides = [1, 1]} : vector<8x290xf32> to vector<8x256xf32>
    %66 = vector.extract_strided_slice %60 {offsets = [0, 18], sizes = [8, 256], strides = [1, 1]} : vector<8x290xf32> to vector<8x256xf32>
    %67 = vector.extract_strided_slice %56 {offsets = [0, 32], sizes = [8, 256], strides = [1, 1]} : vector<8x290xf32> to vector<8x256xf32>
    %68 = vector.extract_strided_slice %58 {offsets = [0, 33], sizes = [8, 256], strides = [1, 1]} : vector<8x290xf32> to vector<8x256xf32>
    %69 = vector.extract_strided_slice %60 {offsets = [0, 34], sizes = [8, 256], strides = [1, 1]} : vector<8x290xf32> to vector<8x256xf32>
    %70 = tpu.concatenate %61, %62, %63, %64, %65, %66, %67, %68, %69 in 0 : vector<8x256xf32>, vector<8x256xf32>, vector<8x256xf32>, vector<8x256xf32>, vector<8x256xf32>, vector<8x256xf32>, vector<8x256xf32>, vector<8x256xf32>, vector<8x256xf32> -> vector<72x256xf32>
    %71 = tpu.concatenate %54, %70 in 1 : vector<72x256xf32>, vector<72x256xf32> -> vector<72x512xf32>
    %c0_23 = arith.constant 0 : index
    %c0_24 = arith.constant 0 : index
    %72 = vector.load %arg3[%c0_23, %c0_24] : memref<8x72xf32, #tpu.memory_space<vmem>>, vector<8x72xf32>
    %cst_25 = arith.constant dense<0.000000e+00> : vector<8x512xf32>
    %73 = tpu.matmul %72, %71, %cst_25 {dimension_numbers = #tpu.dot_dimension_numbers<[1], [0], [0], [1], [0, 0, 1, 1], [], []>} : vector<8x72xf32>, vector<72x512xf32>, vector<8x512xf32> -> vector<8x512xf32>
    %74 = vector.extract_strided_slice %73 {offsets = [0, 0], sizes = [8, 256], strides = [1, 1]} : vector<8x512xf32> to vector<8x256xf32>
    %c0_26 = arith.constant 0 : index
    %c0_27 = arith.constant 0 : index
    %c0_28 = arith.constant 0 : index
    %75 = vector.load %arg4[%c0_26, %c0_27, %c0_28] : memref<2x8x256xf32, #tpu.memory_space<vmem>>, vector<1x8x256xf32>
    %76 = vector.shape_cast %75 : vector<1x8x256xf32> to vector<8x256xf32>
    %77 = vector.shape_cast %74 : vector<8x256xf32> to vector<1x8x256xf32>
    tpu.vector_store %arg4[%c0_26, %c0_27, %c0_28], %77 {strides = array<i32>} : memref<2x8x256xf32, #tpu.memory_space<vmem>>, vector<1x8x256xf32>,
    %78 = vector.extract_strided_slice %73 {offsets = [0, 256], sizes = [8, 256], strides = [1, 1]} : vector<8x512xf32> to vector<8x256xf32>
    %c1 = arith.constant 1 : index
    %c0_29 = arith.constant 0 : index
    %c0_30 = arith.constant 0 : index
    %79 = vector.load %arg4[%c1, %c0_29, %c0_30] : memref<2x8x256xf32, #tpu.memory_space<vmem>>, vector<1x8x256xf32>
    %80 = vector.shape_cast %79 : vector<1x8x256xf32> to vector<8x256xf32>
    %81 = vector.shape_cast %78 : vector<8x256xf32> to vector<1x8x256xf32>
    tpu.vector_store %arg4[%c1, %c0_29, %c0_30], %81 {strides = array<i32>} : memref<2x8x256xf32, #tpu.memory_space<vmem>>, vector<1x8x256xf32>,
    return
  }
  func.func @transform_0(%arg0: i32) -> (i32, i32, i32) {
    %c0_i32 = arith.constant 0 : i32
    %c0_i32_0 = arith.constant 0 : i32
    %c0_i32_1 = arith.constant 0 : i32
    return %arg0, %c0_i32, %c0_i32_0 : i32, i32, i32
  }
  func.func @transform_1(%arg0: i32) -> (i32, i32) {
    %c0_i32 = arith.constant 0 : i32
    %c0_i32_0 = arith.constant 0 : i32
    %c0_i32_1 = arith.constant 0 : i32
    return %c0_i32, %c0_i32_0 : i32, i32
  }
  func.func @transform_2(%arg0: i32) -> (i32, i32) {
    %c0_i32 = arith.constant 0 : i32
    %c0_i32_0 = arith.constant 0 : i32
    %c0_i32_1 = arith.constant 0 : i32
    return %c0_i32, %c0_i32_0 : i32, i32
  }
  func.func @transform_3(%arg0: i32) -> (i32, i32, i32) {
    %c0_i32 = arith.constant 0 : i32
    %c0_i32_0 = arith.constant 0 : i32
    %c0_i32_1 = arith.constant 0 : i32
    return %arg0, %c0_i32, %c0_i32_0 : i32, i32, i32
  }
}

</mosaic_0001>

<bundles_post_ra>
// kernel: tpu_custom_call.1
= control target key start
LH: loop header
LB: loop body
LE: loop exit
PB: predicated region body
PF: predicated region fallthrough
CT: control target
= control target key end

     0   :  { %8 = vsyncpa [#allocation4], 0  ;;  %s948_s0 = inlined_call_operand.hbm [shape: f32[2,4,256], index: 0, kind: input, shape index: {}]   ;;  %s949_s1 = inlined_call_operand.hbm [shape: f32[4,290], index: 1, kind: input, shape index: {}]   ;;  %s950_s2 = inlined_call_operand.hbm [shape: f32[8,72], index: 2, kind: input, shape index: {}]   ;;  %s951_s3 = inlined_call_operand.hbm [shape: f32[2,8,256], index: 3, kind: output, shape index: {}]  }
   0x1   :  { %9 = vsyncpa [#allocation7], 0  ;;  %s29_s14 = sshll.u32 %s949_s1, 4  ;;  %s30_s14 = int_to_ptr.hbm [resolvable:$true] %s29_s14 }
   0x2   :  { %10 = vsyncpa [#allocation5], 0  ;;  %s754_s15 = smov [#allocation6]   ;;  %s15_s19 = sshll.u32 %s948_s0, 4  ;;  %s16_s19 = int_to_ptr.hbm [resolvable:$true] %s15_s19 }
   0x3   :  { %s31_s16 = sshll.u32 %s754_s15, 4  ;;  %s755_s20 = smov [#allocation3]   ;;  %s32_s16 = int_to_ptr.vmem [resolvable:$true] %s31_s16 }
   0x4   :  { %34 = dma.hbm_to_vmem [thread:$0]  %s30_s14, 192, %s32_s16, [#allocation7]  }
   0x5   :  { %s17_s21 = sshll.u32 %s755_s20, 4  ;;  %s756_s22 = smov 128   ;;  %s18_s21 = int_to_ptr.vmem [resolvable:$true] %s17_s21 }
   0x6   :  { %s757_s23 = smov 8   ;;  %s40_s1 = sshll.u32 %s950_s2, 4  ;;  %s41_s1 = int_to_ptr.hbm [resolvable:$true] %s40_s1 }
   0x7   :  { %23 = dma.hbm_to_vmem [thread:$0]  %s16_s19, 256, %s18_s21, [#allocation4], %s756_s22, %s756_s22, %s757_s23  }
   0x8   :  { %s758_s26 = smov [#allocation8]  }
   0x9   :  { %s42_s27 = sshll.u32 %s758_s26, 4  ;;  %s43_s27 = int_to_ptr.vmem [resolvable:$true] %s42_s27 }
   0xa   :  { %45 = dma.hbm_to_vmem [thread:$0]  %s41_s1, 128, %s43_s27, [#allocation7]  }
   0xb   :  { %748 = dma.done.wait [#allocation4], 256  }
   0xc   :  { %749 = vsyncadd [#allocation4], 4294967040 }
   0xd   :  { %750 = dma.done.wait [#allocation7], 320  }
   0xe   :  { %751 = vsyncadd [#allocation7], 4294966976  ;;  %vm58_vm0 = vcmask 138240   ;;  %v759_v0 = vmov 0.0   ;;  %v65_v1 = vld [vmem:[#allocation6 + $0x8] sm:$0xf]  ;;  %v136_v16 = vlaneseq }
   0xf   :  { %60 = vst.msk [vmem:[#allocation2 + $0x18] sm:$0xff] %vm58_vm0, %v759_v0  ;;  %v64_v2 = vld [vmem:[#allocation6] sm:$0xff]  ;;  %v96_v3 = vld [vmem:[#allocation3 + $0x8] sm:$0xff]  ;;  %v95_v5 = vld [vmem:[#allocation3] sm:$0xff]  ;;  %s760_s0 = smov 17   ;;  %vm61_vm1 = vcmask 277640  }
  0x10   :  { %59 = vst.msk [vmem:[#allocation2] sm:$0xff] %vm58_vm0, %v759_v0  ;;  %vm90_vm2 = vcmask 277508   ;;  %vm122_vm3 = vcmask 1043592   ;;  %v137_v18 = vand.u32 127, %v136_v16  ;;  %vm125_vm4 = vcmask 134144   ;;  %s761_s2 = smov 111  }
  0x11   :  { %71 = vst [vmem:[#allocation1 + $0x11] ss:$2 sm:$0xff] %v65_v1  ;;  %s762_s28 = smov 95   ;;  %s763_s29 = smov 94   ;;  %vm298_vm11 = vcmask 769024   ;;  %vm287_vm12 = vcmask 777216  }
  0x12   :  { %78 = vst [vmem:[#allocation1 + $0x31] ss:$2 sm:$0xff] %v65_v1  ;;  %v139_v19 = vadd.s32 256, %v137_v18  ;;  %v144_v22 = vand.u32 15, %v137_v18  ;;  %s764_s30 = smov 127   ;;  %v138_v40 = vadd.s32 128, %v137_v18 }
  0x13   :  { %69 = vst [vmem:[#allocation1 + $0x1] ss:$2 sm:$0xff] %v64_v2  ;;  %s765_s4 = smov 96   ;;  %s766_s5 = smov 110   ;;  %vm276_vm13 = vcmask 785408   ;;  %vm265_vm14 = vcmask 900096  }
  0x14   :  { %76 = vst [vmem:[#allocation1 + $0x21] ss:$2 sm:$0xff] %v64_v2  ;;  %v158_v23 = vand.u32 15, %v139_v19  ;;  %vm807_vm5 = vcmp.eq.s32.totalorder %v144_v22, 1  ;;  %v151_v41 = vand.u32 15, %v138_v40  ;;  %vm837_vm9 = vcmp.eq.s32.totalorder %v144_v22, 0 }
  0x15   :  { %63 = vst.msk [vmem:[#allocation2 + $0x28] sm:$0xff] %vm61_vm1, %v759_v0  ;;  %s767_s6 = smov 112   ;;  %s768_s7 = smov 126   ;;  %vm254_vm15 = vcmask 908288  }
  0x16   :  { %62 = vst.msk [vmem:[#allocation2 + $0x10] sm:$0xff] %vm61_vm1, %v759_v0  ;;  %vm811_vm6 = vcmp.eq.s32.totalorder %v158_v23, 1  ;;  %vm192_vm7 = vcmp.eq.s32.totalorder %v151_v41, 1  ;;  %vm832_vm8 = vcmp.eq.s32.totalorder %v158_v23, 0  ;;  %vm854_vm10 = vcmp.eq.s32.totalorder %v151_v41, 0  ;;  %s769_s8 = smov [#allocation9]  }
  0x17   :  { %vm229_vm1 = vcmask 1031168   ;;  %s486_s9 = sshll.u32 %s769_s8, 4  ;;  %s488_s12 = sshll.u32 %s951_s3, 4  ;;  %s487_s9 = int_to_ptr.vmem [resolvable:$true] %s486_s9  ;;  %s489_s12 = int_to_ptr.hbm [resolvable:$true] %s488_s12 }
  0x18   :  { %v74_v4 = vld.sshfl [vmem:[#allocation1 + $0x10] sm:$0xff pattern:$0x75316420]  ;;  %s770_s13 = smov 256   ;;  %s771_s14 = smov 16  }
  0x19   :  { %103 = vst [vmem:[#allocation1 + $0x10] ss:$2 sm:$0xff] %v96_v3  ;;  %v81_v13 = vld.sshfl [vmem:[#allocation1 + $0x30] sm:$0xff pattern:$0x75316420] }
  0x1a   :  { %v72_v6 = vld.sshfl [vmem:[#allocation1] sm:$0xff pattern:$0x75316420]  ;;  %v73_v7 = vld.sshfl [vmem:[#allocation1 + $0x8] sm:$0xff pattern:$0x75316420] }
  0x1b   :  { %89 = vst [vmem:[#allocation2 + $0x8] sm:$0xf0] %v73_v7  ;;  %v79_v12 = vld.sshfl [vmem:[#allocation1 + $0x20] sm:$0xff pattern:$0x75316420] }
  0x1c   :  { %99 = vst [vmem:[#allocation1] ss:$2 sm:$0xff] %v95_v5  ;;  %v80_v14 = vld.sshfl [vmem:[#allocation1 + $0x28] sm:$0xff pattern:$0x75316420] }
  0x1d   :  { %88 = vst [vmem:[#allocation2] sm:$0xf0] %v72_v6 }
  0x1e   :  { %92 = vst [vmem:[#allocation2 + $0x18] sm:$0xf0] %v79_v12 }
  0x1f   :  { %94 = vst.msk [vmem:[#allocation2 + $0x28] sm:$0xf0] %vm90_vm2, %v81_v13 }
  0x20   :  { %v104_v8 = vld.sshfl [vmem:[#allocation1 + $0x10] sm:$0xff pattern:$0x75316420]  ;;  %v105_v10 = vld.sshfl [vmem:[#allocation1 + $0x18] sm:$0xff pattern:$0x75316420] }
  0x21   :  { %110 = vrot.lane.b32.xlu0 %v104_v8, %s760_s0  ;;  %91 = vst.msk [vmem:[#allocation2 + $0x10] sm:$0xf0] %vm90_vm2, %v74_v4  ;;  %vm215_vm2 = vcmask 1039360  }
  0x22   :  { %93 = vst [vmem:[#allocation2 + $0x20] sm:$0xf0] %v80_v14 }
  0x23   :  { %v100_v9 = vld.sshfl [vmem:[#allocation1] sm:$0xff pattern:$0x75316420]  ;;  %v101_v11 = vld.sshfl [vmem:[#allocation1 + $0x8] sm:$0xff pattern:$0x75316420] }
  0x24   :  { %106 = vrot.lane.b32.xlu1 %v100_v9, %s760_s0 }
  0x29   :  { %112 = vrot.lane.b32.xlu0 %v105_v10, %s760_s0 }
  0x2c   :  { %108 = vrot.lane.b32.xlu1 %v101_v11, %s760_s0 }
  0x93   :  { %v111_v15 = vpop.permute.xlu0 %110 }
  0x94   :  { %127 = vst.msk [vmem:[#allocation2 + $0x18] sm:$0xf] %vm122_vm3, %v111_v15 }
  0x96   :  { %v107_v17 = vpop.permute.xlu1 %106 }
  0x97   :  { %123 = vst.msk [vmem:[#allocation2] sm:$0xf] %vm122_vm3, %v107_v17  ;;  %vm502_vm3 = vmneg %vm837_vm9 }
  0x9b   :  { %v113_v20 = vpop.permute.xlu0 %112  ;;  %v826_v37 = vld [vmem:[#allocation2 + $0x18] sm:$0xff] }
  0x9c   :  { %v115_v21 = vsel %vm58_vm0, %v111_v15, %v113_v20  ;;  %129 = vst.msk [vmem:[#allocation2 + $0x28] sm:$0xf] %vm125_vm4, %v113_v20  ;;  %v203_v49 = vsel %vm807_vm5, 0.0, %v826_v37  ;;  %v188_v58 = vsel %vm837_vm9, 0.0, %v826_v37 }
  0x9d   :  { %128 = vst [vmem:[#allocation2 + $0x20] sm:$0xf] %v115_v21 }
  0x9e   :  { %v109_v24 = vpop.permute.xlu1 %108  ;;  %v805_v26 = vld [vmem:[#allocation2] sm:$0xff] }
  0x9f   :  { %v114_v25 = vsel %vm58_vm0, %v107_v17, %v109_v24  ;;  %126 = vst.msk [vmem:[#allocation2 + $0x10] sm:$0xf] %vm125_vm4, %v109_v24  ;;  %v200_v29 = vsel %vm807_vm5, 0.0, %v805_v26  ;;  %v185_v46 = vsel %vm837_vm9, 0.0, %v805_v26  ;;  %vm243_vm0 = vcmask 916480   ;;  %vm505_vm5 = vmneg %vm854_vm10 }
  0xa0   :  { %124 = vst [vmem:[#allocation2 + $0x8] sm:$0xf] %v114_v25  ;;  %vm393_vm4 = vcmask 588800  }
  0xa3   :  { %v135_v30 = vld [vmem:[#allocation2 + $0x28] sm:$0xff] }
  0xa4   :  { %v537_v31 = vpack.i.bf16 %v805_v26, %v135_v30  ;;  %v205_v32 = vsel %vm811_vm6, 0.0, %v135_v30  ;;  %v824_v36 = vld [vmem:[#allocation2 + $0x20] sm:$0xff]  ;;  %v190_v47 = vsel %vm832_vm8, 0.0, %v135_v30 }
  0xa5   :  { %v547_v33 = vpack.i.bf16 %v200_v29, %v205_v32  ;;  %v572_v39 = vpack.i.bf16 %v824_v36, %v826_v37  ;;  %v204_v48 = vsel %vm192_vm7, 0.0, %v824_v36  ;;  %v557_v51 = vpack.i.bf16 %v185_v46, %v190_v47 }
  0xa6   :  { %538 = vrot.lane.b32.xlu0 %v537_v31, %s761_s2  ;;  %533 = vrot.lane.b32.xlu1 %v537_v31, %s762_s28  ;;  %v132_v34 = vld [vmem:[#allocation2 + $0x10] sm:$0xff]  ;;  %v597_v52 = vpack.i.bf16 %v204_v48, %v203_v49  ;;  %v189_v56 = vsel %vm854_vm10, 0.0, %v824_v36 }
  0xa7   :  { %548 = vrot.lane.b32.xlu2 %v547_v33, %s763_s29  ;;  %v822_v35 = vld [vmem:[#allocation2 + $0x8] sm:$0xff]  ;;  %v202_v44 = vsel %vm811_vm6, 0.0, %v132_v34  ;;  %v187_v55 = vsel %vm832_vm8, 0.0, %v132_v34  ;;  %v602_v59 = vpack.i.bf16 %v189_v56, %v188_v58 }
  0xa8   :  { %v567_v38 = vpack.i.bf16 %v132_v34, %v822_v35  ;;  %v201_v45 = vsel %vm192_vm7, 0.0, %v822_v35  ;;  %v186_v54 = vsel %vm854_vm10, 0.0, %v822_v35 }
  0xa9   :  { %v607_v50 = vpack.i.bf16 %v202_v44, %v201_v45  ;;  %v617_v57 = vpack.i.bf16 %v187_v55, %v186_v54 }
  0xae   :  { %543 = vrot.lane.b32.xlu0 %v537_v31, %s764_s30  ;;  %568 = vrot.lane.b32.xlu1 %v567_v38, %s762_s28 }
  0xaf   :  { %573 = vrot.lane.b32.xlu2 %v572_v39, %s761_s2 }
  0xb6   :  { %553 = vrot.lane.b32.xlu0 %v572_v39, %s762_s28  ;;  %588 = vrot.lane.b32.xlu1 %v567_v38, %s761_s2 }
  0xb7   :  { %593 = vrot.lane.b32.xlu2 %v572_v39, %s764_s30 }
  0xbe   :  { %608 = vrot.lane.b32.xlu1 %v607_v50, %s763_s29  ;;  %558 = vrot.lane.b32.xlu0 %v557_v51, %s765_s4 }
  0xbf   :  { %598 = vrot.lane.b32.xlu2 %v597_v52, %s763_s29 }
  0xc6   :  { %618 = vrot.lane.b32.xlu1 %v617_v57, %s765_s4  ;;  %563 = vrot.lane.b32.xlu0 %v547_v33, %s766_s5 }
  0xc7   :  { %603 = vrot.lane.b32.xlu2 %v602_v59, %s765_s4 }
  0xce   :  { %628 = vrot.lane.b32.xlu1 %v607_v50, %s766_s5  ;;  %578 = vrot.lane.b32.xlu0 %v557_v51, %s767_s6 }
  0xcf   :  { %613 = vrot.lane.b32.xlu2 %v597_v52, %s766_s5 }
  0xd6   :  { %638 = vrot.lane.b32.xlu1 %v617_v57, %s767_s6  ;;  %583 = vrot.lane.b32.xlu0 %v547_v33, %s768_s7 }
  0xd7   :  { %623 = vrot.lane.b32.xlu2 %v602_v59, %s767_s6 }
  0xde   :  { %648 = vrot.lane.b32.xlu0 %v567_v38, %s764_s30 }
  0xdf   :  { %633 = vrot.lane.b32.xlu2 %v597_v52, %s768_s7 }
  0xe7   :  { %643 = vrot.lane.b32.xlu2 %v607_v50, %s768_s7 }
 0x101   :  { %v549_v60 = vpop.permute.xlu2 %548 }
 0x102   :  { %v550_v2 = vunpack.i.l.bf16 %v549_v60  ;;  %v551_v27 = vunpack.i.h.bf16 %v549_v60 }
 0x109   :  { %v871_v61 = vpop.permute.xlu2 %573 }
 0x10a   :  { %v576_v22 = vunpack.i.h.bf16 %v871_v61  ;;  %v575_v23 = vunpack.i.l.bf16 %v871_v61 }
 0x10c   :  { %v348_v31 = vsel %vm254_vm15, %v575_v23, %v576_v22 }
 0x111   :  { %v873_v62 = vpop.permute.xlu2 %593 }
 0x112   :  { %v596_v50 = vunpack.i.h.bf16 %v873_v62  ;;  %v595_v59 = vunpack.i.l.bf16 %v873_v62 }
 0x118   :  { %v875_v63 = vpop.permute.xlu0 %538  ;;  %v534_v0 = vpop.permute.xlu1 %533 }
 0x119   :  { %v599_v1 = vpop.permute.xlu2 %598  ;;  %v535_v10 = vunpack.i.l.bf16 %v534_v0  ;;  %v536_v42 = vunpack.i.h.bf16 %v534_v0  ;;  %v540_v60 = vunpack.i.l.bf16 %v875_v63 }
 0x11a   :  { %v601_v3 = vunpack.i.h.bf16 %v599_v1  ;;  %v600_v4 = vunpack.i.l.bf16 %v599_v1 }
 0x11c   :  { %v388_v5 = vsel %vm298_vm11, %v600_v4, %v601_v3  ;;  %v389_v6 = vsel %vm298_vm11, %v601_v3, %v550_v2 }
 0x11d   :  { %444 = vmatpush.msra.mxu2 %v388_v5  ;;  %464 = vmatpush.msra.mxu3 %v389_v6  ;;  %v349_v5 = vsel %vm254_vm15, %v576_v22, %v540_v60  ;;  %v312_v6 = vsel %vm215_vm2, %v595_v59, %v596_v50 }
 0x120   :  { %v879_v7 = vpop.permute.xlu0 %543  ;;  %v569_v8 = vpop.permute.xlu1 %568 }
 0x121   :  { %v604_v9 = vpop.permute.xlu2 %603  ;;  %v571_v28 = vunpack.i.h.bf16 %v569_v8  ;;  %v570_v32 = vunpack.i.l.bf16 %v569_v8  ;;  %v392_v8 = vld [vmem:[#allocation8] sm:$0xff] }
 0x122   :  { %v606_v13 = vunpack.i.h.bf16 %v604_v9  ;;  %v605_v14 = vunpack.i.l.bf16 %v604_v9 }
 0x123   :  { %v288_v48 = vsel %vm287_vm12, %v536_v42, %v570_v32  ;;  %v289_v49 = vsel %vm287_vm12, %v570_v32, %v571_v28  ;;  %v545_v32 = vunpack.i.l.bf16 %v879_v7 }
 0x124   :  { %v368_v24 = vsel %vm276_vm13, %v605_v14, %v606_v13 }
 0x128   :  { %v554_v11 = vpop.permute.xlu0 %553  ;;  %v881_v12 = vpop.permute.xlu1 %588 }
 0x129   :  { %v556_v15 = vunpack.i.h.bf16 %v554_v11  ;;  %v555_v16 = vunpack.i.l.bf16 %v554_v11  ;;  %v614_v17 = vpop.permute.xlu2 %613  ;;  %v591_v9 = vunpack.i.h.bf16 %v881_v12 }
 0x12a   :  { %v616_v18 = vunpack.i.h.bf16 %v614_v17  ;;  %v615_v19 = vunpack.i.l.bf16 %v614_v17 }
 0x12b   :  { %v378_v20 = vsel %vm287_vm12, %v555_v16, %v556_v15  ;;  %v379_v21 = vsel %vm287_vm12, %v556_v15, %v535_v10  ;;  %v590_v10 = vunpack.i.l.bf16 %v881_v12 }
 0x12c   :  { %445 = vmatpush.msra.mxu2 %v378_v20  ;;  %465 = vmatpush.msra.mxu3 %v379_v21  ;;  %v358_v25 = vsel %vm265_vm14, %v615_v19, %v616_v18 }
 0x12d   :  { %v256_v23 = vsel %vm254_vm15, %v590_v10, %v591_v9 }
 0x12e   :  { %446 = vmatpush.msra.mxu2 %v368_v24 }
 0x130   :  { %v609_v29 = vpop.permute.xlu1 %608  ;;  %447 = vmatpush.msra.mxu2 %v358_v25  ;;  %v559_v30 = vpop.permute.xlu0 %558 }
 0x131   :  { %v611_v33 = vunpack.i.h.bf16 %v609_v29  ;;  %v610_v34 = vunpack.i.l.bf16 %v609_v29  ;;  %v560_v38 = vunpack.i.l.bf16 %v559_v30  ;;  %v624_v39 = vpop.permute.xlu2 %623  ;;  %v561_v54 = vunpack.i.h.bf16 %v559_v30 }
 0x132   :  { %v626_v40 = vunpack.i.h.bf16 %v624_v39  ;;  %v625_v41 = vunpack.i.l.bf16 %v624_v39  ;;  %448 = vmatpush.msra.mxu2 %v348_v31 }
 0x133   :  { %v299_v44 = vsel %vm298_vm11, %v551_v27, %v610_v34  ;;  %v300_v45 = vsel %vm298_vm11, %v610_v34, %v611_v33  ;;  %v369_v46 = vsel %vm276_vm13, %v606_v13, %v560_v38 }
 0x134   :  { %404 = vmatpush.msra.mxu0 %v299_v44  ;;  %424 = vmatpush.msra.mxu1 %v300_v45  ;;  %v338_v47 = vsel %vm243_vm0, %v625_v41, %v626_v40  ;;  %v313_v41 = vsel %vm215_vm2, %v596_v50, %v545_v32  ;;  %v546_v44 = vunpack.i.h.bf16 %v879_v7 }
 0x135   :  { %466 = vmatpush.msra.mxu3 %v369_v46  ;;  %449 = vmatpush.msra.mxu2 %v338_v47 }
 0x136   :  { %405 = vmatpush.msra.mxu0 %v288_v48  ;;  %425 = vmatpush.msra.mxu1 %v289_v49 }
 0x138   :  { %v619_v51 = vpop.permute.xlu1 %618  ;;  %v564_v52 = vpop.permute.xlu0 %563 }
 0x139   :  { %v621_v55 = vunpack.i.h.bf16 %v619_v51  ;;  %v620_v56 = vunpack.i.l.bf16 %v619_v51  ;;  %v565_v57 = vunpack.i.l.bf16 %v564_v52  ;;  %v634_v58 = vpop.permute.xlu2 %633  ;;  %v566_v14 = vunpack.i.h.bf16 %v564_v52 }
 0x13a   :  { %v636_v61 = vunpack.i.h.bf16 %v634_v58  ;;  %v635_v0 = vunpack.i.l.bf16 %v634_v58 }
 0x13b   :  { %v277_v1 = vsel %vm276_vm13, %v561_v54, %v620_v56  ;;  %v278_v2 = vsel %vm276_vm13, %v620_v56, %v621_v55  ;;  %v359_v3 = vsel %vm265_vm14, %v616_v18, %v565_v57  ;;  %v541_v18 = vunpack.i.h.bf16 %v875_v63 }
 0x13c   :  { %406 = vmatpush.msra.mxu0 %v277_v1  ;;  %426 = vmatpush.msra.mxu1 %v278_v2  ;;  %v325_v4 = vsel %vm229_vm1, %v635_v0, %v636_v61 }
 0x13d   :  { %467 = vmatpush.msra.mxu3 %v359_v3  ;;  %450 = vmatpush.msra.mxu2 %v325_v4  ;;  %v255_v22 = vsel %vm254_vm15, %v541_v18, %v590_v10 }
 0x13f   :  { %468 = vmatpush.msra.mxu3 %v349_v5  ;;  %451 = vmatpush.msra.mxu2 %v312_v6 }
 0x140   :  { %v629_v11 = vpop.permute.xlu1 %628  ;;  %v579_v13 = vpop.permute.xlu0 %578 }
 0x141   :  { %v631_v15 = vunpack.i.h.bf16 %v629_v11  ;;  %v630_v16 = vunpack.i.l.bf16 %v629_v11  ;;  %v580_v17 = vunpack.i.l.bf16 %v579_v13  ;;  %509 = vmatpush.msk.msra.mxu2 %vm502_vm3, %v826_v37  ;;  %v644_v21 = vpop.permute.xlu2 %643  ;;  %v581_v37 = vunpack.i.h.bf16 %v579_v13 }
 0x142   :  { %510 = vmatmul.msk.f32.vlgmr.msra.gmra.mxu2 %vm393_vm4, %v392_v8  ;;  %v646_v24 = vunpack.i.h.bf16 %v644_v21  ;;  %v645_v25 = vunpack.i.l.bf16 %v644_v21 }
 0x143   :  { %v266_v19 = vsel %vm265_vm14, %v566_v14, %v630_v16  ;;  %v267_v20 = vsel %vm265_vm14, %v630_v16, %v631_v15  ;;  %v339_v12 = vsel %vm243_vm0, %v626_v40, %v580_v17 }
 0x144   :  { %407 = vmatpush.msra.mxu0 %v266_v19  ;;  %427 = vmatpush.msra.mxu1 %v267_v20  ;;  %v231_v40 = vsel %vm229_vm1, %v645_v25, %v646_v24 }
 0x145   :  { %469 = vmatpush.msra.mxu3 %v339_v12 }
 0x146   :  { %408 = vmatpush.msra.mxu0 %v255_v22  ;;  %428 = vmatpush.msra.mxu1 %v256_v23 }
 0x148   :  { %v639_v63 = vpop.permute.xlu1 %638  ;;  %v584_v27 = vpop.permute.xlu0 %583 }
 0x149   :  { %v641_v28 = vunpack.i.h.bf16 %v639_v63  ;;  %v640_v29 = vunpack.i.l.bf16 %v639_v63  ;;  %v586_v30 = vunpack.i.h.bf16 %v584_v27  ;;  %v585_v31 = vunpack.i.l.bf16 %v584_v27 }
 0x14b   :  { %v244_v33 = vsel %vm243_vm0, %v581_v37, %v640_v29  ;;  %v245_v34 = vsel %vm243_vm0, %v640_v29, %v641_v28  ;;  %v326_v38 = vsel %vm229_vm1, %v636_v61, %v585_v31  ;;  %v230_v39 = vsel %vm229_vm1, %v586_v30, %v645_v25 }
 0x14c   :  { %409 = vmatpush.msra.mxu0 %v244_v33  ;;  %429 = vmatpush.msra.mxu1 %v245_v34 }
 0x14d   :  { %470 = vmatpush.msra.mxu3 %v326_v38 }
 0x14e   :  { %410 = vmatpush.msra.mxu0 %v230_v39  ;;  %430 = vmatpush.msra.mxu1 %v231_v40 }
 0x14f   :  { %471 = vmatpush.msra.mxu3 %v313_v41 }
 0x150   :  { %v649_v42 = vpop.permute.xlu0 %648 }
 0x151   :  { %v651_v45 = vunpack.i.h.bf16 %v649_v42  ;;  %v650_v46 = vunpack.i.l.bf16 %v649_v42  ;;  %512 = vmatpush.msk.msra.mxu3 %vm505_vm5, %v824_v36 }
 0x152   :  { %513 = vmatmul.msk.f32.vlgmr.msra.gmra.mxu3 %vm393_vm4, %v392_v8 }
 0x153   :  { %v216_v47 = vsel %vm215_vm2, %v546_v44, %v650_v46  ;;  %v217_v48 = vsel %vm215_vm2, %v650_v46, %v651_v45 }
 0x154   :  { %411 = vmatpush.msra.mxu0 %v216_v47  ;;  %431 = vmatpush.msra.mxu1 %v217_v48 }
 0x156   :  { %503 = vmatpush.msk.msra.mxu0 %vm502_vm3, %v805_v26  ;;  %506 = vmatpush.msk.msra.mxu1 %vm505_vm5, %v822_v35 }
 0x157   :  { %504 = vmatmul.msk.f32.vlgmr.msra.gmra.mxu0 %vm393_vm4, %v392_v8  ;;  %507 = vmatmul.msk.f32.vlgmr.msra.gmra.mxu1 %vm393_vm4, %v392_v8 }
 0x1c5   :  { %v454_v36 = vpop.f32.mrf.mxu2 }
 0x1c6   :  { %480 = vst [vmem:[#allocation9 + $0x10] sm:$0xff] %v454_v36 }
 0x1d4   :  { %v414_v53 = vpop.f32.mrf.mxu0  ;;  %v434_v62 = vpop.f32.mrf.mxu1 }
 0x1d5   :  { %477 = vst [vmem:[#allocation9] sm:$0xff] %v414_v53  ;;  %v474_v26 = vpop.f32.mrf.mxu3 }
 0x1d6   :  { %478 = vst [vmem:[#allocation9 + $0x8] sm:$0xff] %v434_v62 }
 0x1d7   :  { %481 = vst [vmem:[#allocation9 + $0x18] sm:$0xff] %v474_v26 }
 0x1d8   :  { %494 = dma.vmem_to_hbm [thread:$0]  %s487_s9, 512, %s489_s12, [#allocation5], %s770_s13, %s770_s13, %s771_s14  }
 0x1d9   :  { %752 = dma.done.wait [#allocation5], 512  }
 0x1da   :  { %753 = vsyncadd [#allocation5], 4294966784 }
 0x1db   :  { %499 = vsyncpa [#allocation4], 1 }
 0x1dc   :  { %500 = vsyncpa [#allocation7], 1 }
 0x1dd   :  { %501 = vsyncpa [#allocation5], 1 }

</bundles_post_ra>
